<compile_context>
chip_gen: v7x
topology: tpu7x:2x2x1
jax: 0.10.0
libtpu: 0.0.40
codegen_flags: <defaults>
</compile_context>

<pallas_src>
import functools

import jax
import jax.numpy as jnp
from jax.experimental import pallas as pl
from jax.experimental.pallas import tpu as pltpu

BN_EPS = 1e-5


def _round_up(x, m):
    return (x + m - 1) // m * m


def _im2col(x, k, s, p):
    """(N,C,H,W) -> patches (N*OH*OW, C*k*k) matching weight.reshape(oup, C*k*k)."""
    N, C, H, W = x.shape
    OH = (H + 2 * p - k) // s + 1
    OW = (W + 2 * p - k) // s + 1
    xp = jnp.pad(x, ((0, 0), (0, 0), (p, p), (p, p)))
    cols = []
    for ki in range(k):
        for kj in range(k):
            cols.append(xp[:, :, ki:ki + s * OH:s, kj:kj + s * OW:s])  # (N,C,OH,OW)
    pat = jnp.stack(cols, axis=0).reshape(k, k, N, C, OH, OW)
    # (N, OH, OW, C, ki, kj) -> (M, C*k*k)
    pat = jnp.transpose(pat, (2, 4, 5, 3, 0, 1)).reshape(N * OH * OW, C * k * k)
    return pat, (OH, OW)


# --------------------------------------------------------------------------
# pass 1: tiled conv-as-matmul + per-tile BN partial statistics
# --------------------------------------------------------------------------
def _conv_stats_kernel(pat_ref, w_ref, conv_ref, sum_ref, sumsq_ref):
    kk = pl.program_id(1)

    @pl.when(kk == 0)
    def _init():
        conv_ref[...] = jnp.zeros_like(conv_ref)

    # MXU matmul, bf16 inputs, f32 accumulation into the resident output block.
    conv_ref[...] += jnp.dot(pat_ref[...], w_ref[...],
                             preferred_element_type=jnp.float32)

    @pl.when(kk == pl.num_programs(1) - 1)
    def _stats():
        acc = conv_ref[...]                                  # (tile_m, oup_p) f32
        oup_p = acc.shape[1]
        # One-pass stats: per-channel sum and sum-of-squares for this M tile.
        s1 = jnp.sum(acc, axis=0, keepdims=True)             # (1, oup_p)
        s2 = jnp.sum(acc * acc, axis=0, keepdims=True)       # (1, oup_p)
        sum_ref[0] = jnp.broadcast_to(s1, (8, oup_p))
        sumsq_ref[0] = jnp.broadcast_to(s2, (8, oup_p))


# --------------------------------------------------------------------------
# pass 2: tiled BatchNorm-apply + PReLU
# --------------------------------------------------------------------------
def _bn_act_kernel(conv_ref, scale_ref, shift_ref, alpha_ref, o_ref, *, linear):
    y = conv_ref[...] * scale_ref[...] + shift_ref[...]
    if linear:
        o_ref[...] = y
    else:
        o_ref[...] = jnp.where(y >= 0.0, y, alpha_ref[...] * y)


@functools.partial(jax.jit, static_argnames=("k", "s", "p", "linear", "tile_m"))
def conv_block_forward(x, weight, gamma, beta, alpha, *, k, s, p,
                       linear=False, tile_m=256):
    """x: (N,C,H,W) f32, weight: (oup,C,k,k) f32, gamma/beta/alpha: (oup,) f32."""
    N, C, H, W = x.shape
    oup = weight.shape[0]
    M_true = N * ((H + 2 * p - k) // s + 1) * ((W + 2 * p - k) // s + 1)
    Kdim = C * k * k

    # ---- glue: im2col (fused by XLA under jit) ---------------------------
    pat, (OH, OW) = _im2col(x, k, s, p)
    w_mat = weight.reshape(oup, Kdim).T                       # (Kdim, oup)

    # ---- tiling / padding -------------------------------------------------
    oup_p = _round_up(oup, 128)              # lane-dense output channels
    tile_m = min(tile_m, _round_up(M_true, 8))
    M_p = _round_up(M_true, tile_m)
    n_m = M_p // tile_m
    if Kdim <= 512:                          # full-extent K block (no K grid axis)
        tile_k, Kdim_p = Kdim, Kdim
    else:                                    # tile large C*k*k reductions
        tile_k = 512
        Kdim_p = _round_up(Kdim, tile_k)
    n_k = Kdim_p // tile_k

    # bf16 MXU inputs; zero-padded rows/cols contribute nothing to the matmul
    # or to the channel statistics.
    pat_p = jnp.pad(pat, ((0, M_p - M_true), (0, Kdim_p - Kdim))).astype(jnp.bfloat16)
    w_p = jnp.pad(w_mat, ((0, Kdim_p - Kdim), (0, oup_p - oup))).astype(jnp.bfloat16)

    # ---- pass 1: conv tiles + per-tile channel partials -------------------
    conv, part_sum, part_sumsq = pl.pallas_call(
        _conv_stats_kernel,
        out_shape=(
            jax.ShapeDtypeStruct((M_p, oup_p), jnp.float32),
            jax.ShapeDtypeStruct((n_m, 8, oup_p), jnp.float32),
            jax.ShapeDtypeStruct((n_m, 8, oup_p), jnp.float32),
        ),
        grid=(n_m, n_k),
        in_specs=[
            pl.BlockSpec((tile_m, tile_k), lambda m, kk: (m, kk)),
            pl.BlockSpec((tile_k, oup_p), lambda m, kk: (kk, 0)),
        ],
        out_specs=(
            pl.BlockSpec((tile_m, oup_p), lambda m, kk: (m, 0)),
            pl.BlockSpec((1, 8, oup_p), lambda m, kk: (m, 0, 0)),
            pl.BlockSpec((1, 8, oup_p), lambda m, kk: (m, 0, 0)),
        ),
        compiler_params=pltpu.CompilerParams(
            dimension_semantics=("parallel", "arbitrary")),
    )(pat_p, w_p)

    # ---- tiny host-side reduction -> BN scale/shift ------------------------
    ch_sum = jnp.sum(part_sum[:, 0, :], axis=0)               # (oup_p,)
    ch_sumsq = jnp.sum(part_sumsq[:, 0, :], axis=0)           # (oup_p,)
    mean = ch_sum / M_true                                    # true (unpadded) M
    var = jnp.maximum(ch_sumsq / M_true - mean * mean, 0.0)
    inv_std = jax.lax.rsqrt(var + BN_EPS)

    gamma_p = jnp.pad(gamma.astype(jnp.float32), (0, oup_p - oup))
    beta_p = jnp.pad(beta.astype(jnp.float32), (0, oup_p - oup))
    alpha_p = jnp.pad(alpha.astype(jnp.float32), (0, oup_p - oup))
    scale = (gamma_p * inv_std).reshape(1, oup_p)
    shift = (beta_p - mean * gamma_p * inv_std).reshape(1, oup_p)
    alpha2 = alpha_p.reshape(1, oup_p)

    # ---- pass 2: normalize + PReLU ----------------------------------------
    out_p = pl.pallas_call(
        functools.partial(_bn_act_kernel, linear=linear),
        out_shape=jax.ShapeDtypeStruct((M_p, oup_p), jnp.float32),
        grid=(n_m,),
        in_specs=[
            pl.BlockSpec((tile_m, oup_p), lambda m: (m, 0)),
            pl.BlockSpec((1, oup_p), lambda m: (0, 0)),
            pl.BlockSpec((1, oup_p), lambda m: (0, 0)),
            pl.BlockSpec((1, oup_p), lambda m: (0, 0)),
        ],
        out_specs=pl.BlockSpec((tile_m, oup_p), lambda m: (m, 0)),
        compiler_params=pltpu.CompilerParams(dimension_semantics=("parallel",)),
    )(conv, scale, shift, alpha2)

    # (M, oup) -> (N, OH, OW, oup) -> NCHW (see TODO about keeping NHWC)
    out = out_p[:M_true, :oup].reshape(N, OH, OW, oup)
    return jnp.transpose(out, (0, 3, 1, 2))


# --------------------------------------------------------------------------
# references
# --------------------------------------------------------------------------
def _reference_f32(x, weight, gamma, beta, alpha, *, k, s, p, linear=False):
    """Pure-JAX f32 reference mirroring the PyTorch module (training-mode BN)."""
    y = jax.lax.conv_general_dilated(
        x, weight, window_strides=(s, s), padding=[(p, p), (p, p)],
        dimension_numbers=("NCHW", "OIHW", "NCHW"))
    mean = jnp.mean(y, axis=(0, 2, 3), keepdims=True)
    var = jnp.mean((y - mean) ** 2, axis=(0, 2, 3), keepdims=True)
    y = (y - mean) * jax.lax.rsqrt(var + BN_EPS)
    y = gamma.reshape(1, -1, 1, 1) * y + beta.reshape(1, -1, 1, 1)
    if linear:
        return y
    return jnp.where(y >= 0.0, y, alpha.reshape(1, -1, 1, 1) * y)


def _reference_matched(x, weight, gamma, beta, alpha, *, k, s, p, linear=False):
    """Reference with the kernel's precision (bf16 matmul, f32 accum, 1-pass var)."""
    N, C, H, W = x.shape
    oup = weight.shape[0]
    pat, (OH, OW) = _im2col(x, k, s, p)
    w_mat = weight.reshape(oup, -1).T
    y = jnp.dot(pat.astype(jnp.bfloat16), w_mat.astype(jnp.bfloat16),
                preferred_element_type=jnp.float32)           # (M, oup)
    mean = jnp.mean(y, axis=0, keepdims=True)
    var = jnp.maximum(jnp.mean(y * y, axis=0, keepdims=True) - mean * mean, 0.0)
    yb = gamma.reshape(1, -1) * ((y - mean) * jax.lax.rsqrt(var + BN_EPS)) \
        + beta.reshape(1, -1)
    if not linear:
        yb = jnp.where(yb >= 0.0, yb, alpha.reshape(1, -1) * yb)
    return jnp.transpose(yb.reshape(N, OH, OW, oup), (0, 3, 1, 2))


if __name__ == "__main__":
    # ConvBlock(inp=4, oup=8, k=3, s=1, p=1, dw=False, linear=False)
    N, C, H, W = 2, 4, 16, 16
    oup, k, s, p = 8, 3, 1, 1

    key = jax.random.PRNGKey(0)
    kx, kw = jax.random.split(key)
    x = jax.random.normal(kx, (N, C, H, W), dtype=jnp.float32)

    fan_in = C * k * k
    bound = 1.0 / (fan_in ** 0.5)
    weight = jax.random.uniform(kw, (oup, C, k, k), dtype=jnp.float32,
                                minval=-bound, maxval=bound)
    gamma = jnp.ones((oup,), jnp.float32)        # BatchNorm2d.weight
    beta = jnp.zeros((oup,), jnp.float32)        # BatchNorm2d.bias
    alpha = jnp.full((oup,), 0.25, jnp.float32)  # PReLU per-channel init

    out = conv_block_forward(x, weight, gamma, beta, alpha, k=k, s=s, p=p,
                             linear=False)
    out = jax.block_until_ready(out)
    assert out.shape == (N, oup, H, W)

    # Loose check vs full-f32 reference (bf16 MXU inputs => relaxed tolerance).
    ref_f32 = _reference_f32(x, weight, gamma, beta, alpha, k=k, s=s, p=p)
    err_f32 = float(jnp.max(jnp.abs(out - ref_f32)))
    assert jnp.allclose(out, ref_f32, atol=5e-2, rtol=5e-2), err_f32

    # Tight check vs a reference with matching (bf16-conv) precision.
    ref_m = _reference_matched(x, weight, gamma, beta, alpha, k=k, s=s, p=p)
    err_m = float(jnp.max(jnp.abs(out - ref_m)))
    assert jnp.allclose(out, ref_m, atol=1e-3, rtol=1e-3), err_m

    print("KERNEL_OK")
</pallas_src>

<mosaic_0001>
module attributes {stable_mosaic.version = 11 : i64} {
  func.func @_conv_stats_kernel(%arg0: i32, %arg1: i32, %arg2: memref<256x36xbf16, #tpu.memory_space<vmem>>, %arg3: memref<36x128xbf16, #tpu.memory_space<vmem>>, %arg4: memref<256x128xf32, #tpu.memory_space<vmem>>, %arg5: memref<1x8x128xf32, #tpu.memory_space<vmem>>, %arg6: memref<1x8x128xf32, #tpu.memory_space<vmem>>) attributes {dimension_semantics = [#tpu.dimension_semantics<parallel>, #tpu.dimension_semantics<arbitrary>], iteration_bounds = array<i64: 2, 1>, scalar_prefetch = 0 : i64, scratch_operands = 0 : i64, tpu.core_type = #tpu.core_type<tc>, window_params = [{transform_indices = @transform_0, window_bounds = array<i64: 256, 36>}, {transform_indices = @transform_1, window_bounds = array<i64: 36, 128>}, {transform_indices = @transform_2, window_bounds = array<i64: 256, 128>}, {transform_indices = @transform_3, window_bounds = array<i64: 1, 8, 128>}, {transform_indices = @transform_4, window_bounds = array<i64: 1, 8, 128>}]} {
    %c0_i32 = arith.constant 0 : i32
    %0 = arith.cmpi eq, %arg1, %c0_i32 : i32
    %1 = arith.extui %0 : i1 to i32
    %c0_i32_0 = arith.constant 0 : i32
    %2 = arith.cmpi ne, %1, %c0_i32_0 : i32
    scf.if %2 {
      %cst_10 = arith.constant 0.000000e+00 : f32
      %12 = vector.broadcast %cst_10 : f32 to vector<256x128xf32>
      %c0_11 = arith.constant 0 : index
      %c0_12 = arith.constant 0 : index
      %13 = vector.load %arg4[%c0_11, %c0_12] : memref<256x128xf32, #tpu.memory_space<vmem>>, vector<256x128xf32>
      tpu.vector_store %arg4[%c0_11, %c0_12], %12 {strides = array<i32>} : memref<256x128xf32, #tpu.memory_space<vmem>>, vector<256x128xf32>,
    } else {
    }
    %c0 = arith.constant 0 : index
    %c0_1 = arith.constant 0 : index
    %3 = vector.load %arg4[%c0, %c0_1] : memref<256x128xf32, #tpu.memory_space<vmem>>, vector<256x128xf32>
    %c0_2 = arith.constant 0 : index
    %c0_3 = arith.constant 0 : index
    %4 = vector.load %arg2[%c0_2, %c0_3] : memref<256x36xbf16, #tpu.memory_space<vmem>>, vector<256x36xbf16>
    %c0_4 = arith.constant 0 : index
    %c0_5 = arith.constant 0 : index
    %5 = vector.load %arg3[%c0_4, %c0_5] : memref<36x128xbf16, #tpu.memory_space<vmem>>, vector<36x128xbf16>
    %cst = arith.constant dense<0.000000e+00> : vector<256x128xf32>
    %6 = tpu.matmul %4, %5, %cst {dimension_numbers = #tpu.dot_dimension_numbers<[1], [0], [0], [1], [0, 0, 1, 1], [], []>} : vector<256x36xbf16>, vector<36x128xbf16>, vector<256x128xf32> -> vector<256x128xf32>
    %7 = arith.addf %3, %6 : vector<256x128xf32>
    %c0_6 = arith.constant 0 : index
    %c0_7 = arith.constant 0 : index
    %8 = vector.load %arg4[%c0_6, %c0_7] : memref<256x128xf32, #tpu.memory_space<vmem>>, vector<256x128xf32>
    tpu.vector_store %arg4[%c0_6, %c0_7], %7 {strides = array<i32>} : memref<256x128xf32, #tpu.memory_space<vmem>>, vector<256x128xf32>,
    %c0_i32_8 = arith.constant 0 : i32
    %9 = arith.cmpi eq, %arg1, %c0_i32_8 : i32
    %10 = arith.extui %9 : i1 to i32
    %c0_i32_9 = arith.constant 0 : i32
    %11 = arith.cmpi ne, %10, %c0_i32_9 : i32
    scf.if %11 {
      %c0_10 = arith.constant 0 : index
      %c0_11 = arith.constant 0 : index
      %12 = vector.load %arg4[%c0_10, %c0_11] : memref<256x128xf32, #tpu.memory_space<vmem>>, vector<256x128xf32>
      %cst_12 = arith.constant dense<0.000000e+00> : vector<128xf32>
      %13 = vector.multi_reduction <add>, %12, %cst_12 [0] : vector<256x128xf32> to vector<128xf32>
      %14 = vector.shape_cast %13 : vector<128xf32> to vector<1x128xf32>
      %15 = arith.mulf %12, %12 : vector<256x128xf32>
      %cst_13 = arith.constant dense<0.000000e+00> : vector<128xf32>
      %16 = vector.multi_reduction <add>, %15, %cst_13 [0] : vector<256x128xf32> to vector<128xf32>
      %17 = vector.shape_cast %16 : vector<128xf32> to vector<1x128xf32>
      %18 = vector.shape_cast %14 : vector<1x128xf32> to vector<1x128xf32>
      %19 = vector.broadcast %18 : vector<1x128xf32> to vector<8x128xf32>
      %c0_14 = arith.constant 0 : index
      %c0_15 = arith.constant 0 : index
      %c0_16 = arith.constant 0 : index
      %20 = vector.load %arg5[%c0_14, %c0_15, %c0_16] : memref<1x8x128xf32, #tpu.memory_space<vmem>>, vector<1x8x128xf32>
      %21 = vector.shape_cast %20 : vector<1x8x128xf32> to vector<8x128xf32>
      %22 = vector.shape_cast %19 : vector<8x128xf32> to vector<1x8x128xf32>
      tpu.vector_store %arg5[%c0_14, %c0_15, %c0_16], %22 {strides = array<i32>} : memref<1x8x128xf32, #tpu.memory_space<vmem>>, vector<1x8x128xf32>,
      %23 = vector.shape_cast %17 : vector<1x128xf32> to vector<1x128xf32>
      %24 = vector.broadcast %23 : vector<1x128xf32> to vector<8x128xf32>
      %c0_17 = arith.constant 0 : index
      %c0_18 = arith.constant 0 : index
      %c0_19 = arith.constant 0 : index
      %25 = vector.load %arg6[%c0_17, %c0_18, %c0_19] : memref<1x8x128xf32, #tpu.memory_space<vmem>>, vector<1x8x128xf32>
      %26 = vector.shape_cast %25 : vector<1x8x128xf32> to vector<8x128xf32>
      %27 = vector.shape_cast %24 : vector<8x128xf32> to vector<1x8x128xf32>
      tpu.vector_store %arg6[%c0_17, %c0_18, %c0_19], %27 {strides = array<i32>} : memref<1x8x128xf32, #tpu.memory_space<vmem>>, vector<1x8x128xf32>,
    } else {
    }
    return
  }
  func.func @transform_0(%arg0: i32, %arg1: i32) -> (i32, i32) {
    %c0_i32 = arith.constant 0 : i32
    return %arg0, %arg1 : i32, i32
  }
  func.func @transform_1(%arg0: i32, %arg1: i32) -> (i32, i32) {
    %c0_i32 = arith.constant 0 : i32
    %c0_i32_0 = arith.constant 0 : i32
    return %arg1, %c0_i32 : i32, i32
  }
  func.func @transform_2(%arg0: i32, %arg1: i32) -> (i32, i32) {
    %c0_i32 = arith.constant 0 : i32
    %c0_i32_0 = arith.constant 0 : i32
    return %arg0, %c0_i32 : i32, i32
  }
  func.func @transform_3(%arg0: i32, %arg1: i32) -> (i32, i32, i32) {
    %c0_i32 = arith.constant 0 : i32
    %c0_i32_0 = arith.constant 0 : i32
    %c0_i32_1 = arith.constant 0 : i32
    return %arg0, %c0_i32, %c0_i32_0 : i32, i32, i32
  }
  func.func @transform_4(%arg0: i32, %arg1: i32) -> (i32, i32, i32) {
    %c0_i32 = arith.constant 0 : i32
    %c0_i32_0 = arith.constant 0 : i32
    %c0_i32_1 = arith.constant 0 : i32
    return %arg0, %c0_i32, %c0_i32_0 : i32, i32, i32
  }
}

module attributes {stable_mosaic.version = 11 : i64} {
  func.func @_bn_act_kernel(%arg0: i32, %arg1: memref<256x128xf32, #tpu.memory_space<vmem>>, %arg2: memref<1x128xf32, #tpu.memory_space<vmem>>, %arg3: memref<1x128xf32, #tpu.memory_space<vmem>>, %arg4: memref<1x128xf32, #tpu.memory_space<vmem>>, %arg5: memref<256x128xf32, #tpu.memory_space<vmem>>) attributes {dimension_semantics = [#tpu.dimension_semantics<parallel>], iteration_bounds = array<i64: 2>, scalar_prefetch = 0 : i64, scratch_operands = 0 : i64, tpu.core_type = #tpu.core_type<tc>, window_params = [{transform_indices = @transform_0, window_bounds = array<i64: 256, 128>}, {pipeline_mode = #tpu.pipeline_mode<synchronous>, transform_indices = @transform_1, window_bounds = array<i64: 1, 128>}, {pipeline_mode = #tpu.pipeline_mode<synchronous>, transform_indices = @transform_2, window_bounds = array<i64: 1, 128>}, {pipeline_mode = #tpu.pipeline_mode<synchronous>, transform_indices = @transform_3, window_bounds = array<i64: 1, 128>}, {transform_indices = @transform_4, window_bounds = array<i64: 256, 128>}]} {
    %c0 = arith.constant 0 : index
    %c0_0 = arith.constant 0 : index
    %0 = vector.load %arg1[%c0, %c0_0] : memref<256x128xf32, #tpu.memory_space<vmem>>, vector<256x128xf32>
    %c0_1 = arith.constant 0 : index
    %c0_2 = arith.constant 0 : index
    %1 = vector.load %arg2[%c0_1, %c0_2] : memref<1x128xf32, #tpu.memory_space<vmem>>, vector<1x128xf32>
    %2 = vector.broadcast %1 : vector<1x128xf32> to vector<256x128xf32>
    %3 = arith.mulf %0, %2 : vector<256x128xf32>
    %c0_3 = arith.constant 0 : index
    %c0_4 = arith.constant 0 : index
    %4 = vector.load %arg3[%c0_3, %c0_4] : memref<1x128xf32, #tpu.memory_space<vmem>>, vector<1x128xf32>
    %5 = vector.broadcast %4 : vector<1x128xf32> to vector<256x128xf32>
    %6 = arith.addf %3, %5 : vector<256x128xf32>
    %cst = arith.constant 0.000000e+00 : f32
    %7 = vector.broadcast %cst : f32 to vector<256x128xf32>
    %8 = arith.cmpf oge, %6, %7 : vector<256x128xf32>
    %c0_5 = arith.constant 0 : index
    %c0_6 = arith.constant 0 : index
    %9 = vector.load %arg4[%c0_5, %c0_6] : memref<1x128xf32, #tpu.memory_space<vmem>>, vector<1x128xf32>
    %10 = vector.broadcast %9 : vector<1x128xf32> to vector<256x128xf32>
    %11 = arith.mulf %10, %6 : vector<256x128xf32>
    %12 = arith.select %8, %6, %11 : vector<256x128xi1>, vector<256x128xf32>
    %c0_7 = arith.constant 0 : index
    %c0_8 = arith.constant 0 : index
    %13 = vector.load %arg5[%c0_7, %c0_8] : memref<256x128xf32, #tpu.memory_space<vmem>>, vector<256x128xf32>
    tpu.vector_store %arg5[%c0_7, %c0_8], %12 {strides = array<i32>} : memref<256x128xf32, #tpu.memory_space<vmem>>, vector<256x128xf32>,
    return
  }
  func.func @transform_0(%arg0: i32) -> (i32, i32) {
    %c0_i32 = arith.constant 0 : i32
    %c0_i32_0 = arith.constant 0 : i32
    return %arg0, %c0_i32 : i32, i32
  }
  func.func @transform_1(%arg0: i32) -> (i32, i32) {
    %c0_i32 = arith.constant 0 : i32
    %c0_i32_0 = arith.constant 0 : i32
    %c0_i32_1 = arith.constant 0 : i32
    return %c0_i32, %c0_i32_0 : i32, i32
  }
  func.func @transform_2(%arg0: i32) -> (i32, i32) {
    %c0_i32 = arith.constant 0 : i32
    %c0_i32_0 = arith.constant 0 : i32
    %c0_i32_1 = arith.constant 0 : i32
    return %c0_i32, %c0_i32_0 : i32, i32
  }
  func.func @transform_3(%arg0: i32) -> (i32, i32) {
    %c0_i32 = arith.constant 0 : i32
    %c0_i32_0 = arith.constant 0 : i32
    %c0_i32_1 = arith.constant 0 : i32
    return %c0_i32, %c0_i32_0 : i32, i32
  }
  func.func @transform_4(%arg0: i32) -> (i32, i32) {
    %c0_i32 = arith.constant 0 : i32
    %c0_i32_0 = arith.constant 0 : i32
    return %arg0, %c0_i32 : i32, i32
  }
}

</mosaic_0001>

<bundles_post_ra>
// kernel: conv_block_forward.3
= control target key start
LH: loop header
LB: loop body
LE: loop exit
PB: predicated region body
PF: predicated region fallthrough
CT: control target
= control target key end

     0   :  { %s557_s15 = smov 0   ;;  %s756_s0 = inlined_call_operand.vmem [shape: f32[512,128], index: 0, kind: input, shape index: {}]   ;;  %s757_s1 = inlined_call_operand.vmem [shape: f32[1,128], index: 1, kind: input, shape index: {}]   ;;  %s758_s2 = inlined_call_operand.vmem [shape: f32[1,128], index: 2, kind: input, shape index: {}]   ;;  %s759_s3 = inlined_call_operand.vmem [shape: f32[1,128], index: 3, kind: input, shape index: {}]   ;;  %s760_s4 = inlined_call_operand.vmem [shape: f32[512,128], index: 4, kind: output, shape index: {}]  }
   0x1 LB: > { %s502_s16 = sadd.s32 4294967295, %s530_s15   ;;  %p506_p0 = scmp.ge.s32.totalorder %s530_s15, 1  ;;  %s530_s15 = sphi %s557_s15, %s14_s15  }
   0x2   : > { %p163_p1 = scmp.lt.s32.totalorder %s530_s15, 3 }
   0x4   : > { %p164_p2 = pnand %p506_p0, %p163_p1 }
   0x5   : > { %s507_s17 = sshll.u32 (!%p164_p2), %s502_s16, 5  ;;  %v571_v0 = vld [vmem:[%s757_s1] ss:$0 sm:$0xff] (!%p164_p2) }
   0x6   : > { %167 = sbr.rel (%p164_p2) target bundleno = 62 (0x3e), region = 36  ;;  %p190_p3 = scmp.lt.s32.totalorder (!%p164_p2), %s507_s17, 63  ;;  %v581_v1 = vld [vmem:[%s758_s2] ss:$0 sm:$0xff] (!%p164_p2) }
   0x7   : > { %v595_v11 = vld [vmem:[%s759_s3] ss:$0 sm:$0xff] (!%p164_p2) }
   0xd   : > { %s762_s17 = smov (!%p190_p3, %s507_s17), 63 }
   0xe   : > { %s508_s18 = sshll.u32 %s762_s17, 3 }
   0xf   : > { %s576_s23 = scalar_lea.vmem %s756_s0, %s508_s18  ;;  %s613_s30 = scalar_lea.vmem %s760_s4, %s508_s18 }
  0x10   : > { %v201_v2 = vld [vmem:[%s576_s23] sm:$0xff]  ;;  %v202_v3 = vld [vmem:[%s576_s23 + $0x8] sm:$0xff]  ;;  %v203_v4 = vld [vmem:[%s576_s23 + $0x10] sm:$0xff] }
  0x11   : > { %v240_v5 = vmul.f32 %v571_v0, %v201_v2  ;;  %v241_v6 = vmul.f32 %v571_v0, %v202_v3  ;;  %v242_v7 = vmul.f32 %v571_v0, %v203_v4  ;;  %v204_v8 = vld [vmem:[%s576_s23 + $0x18] sm:$0xff]  ;;  %v205_v9 = vld [vmem:[%s576_s23 + $0x20] sm:$0xff]  ;;  %v206_v10 = vld [vmem:[%s576_s23 + $0x28] sm:$0xff] }
  0x12   : > { %v243_v12 = vmul.f32 %v571_v0, %v204_v8  ;;  %v244_v13 = vmul.f32 %v571_v0, %v205_v9  ;;  %v245_v14 = vmul.f32 %v571_v0, %v206_v10  ;;  %v207_v15 = vld [vmem:[%s576_s23 + $0x30] sm:$0xff]  ;;  %v208_v16 = vld [vmem:[%s576_s23 + $0x38] sm:$0xff]  ;;  %v209_v29 = vld [vmem:[%s576_s23 + $0x40] sm:$0xff] }
  0x13   : > { %v279_v17 = vadd.f32 %v581_v1, %v240_v5  ;;  %v280_v18 = vadd.f32 %v581_v1, %v241_v6  ;;  %v281_v19 = vadd.f32 %v581_v1, %v242_v7  ;;  %v246_v20 = vmul.f32 %v571_v0, %v207_v15  ;;  %v210_v33 = vld [vmem:[%s576_s23 + $0x48] sm:$0xff]  ;;  %v211_v34 = vld [vmem:[%s576_s23 + $0x50] sm:$0xff]  ;;  %v212_v35 = vld [vmem:[%s576_s23 + $0x58] sm:$0xff] }
  0x14   : > { %v282_v21 = vadd.f32 %v581_v1, %v243_v12  ;;  %v283_v22 = vadd.f32 %v581_v1, %v244_v13  ;;  %v284_v23 = vadd.f32 %v581_v1, %v245_v14  ;;  %v247_v24 = vmul.f32 %v571_v0, %v208_v16  ;;  %v213_v47 = vld [vmem:[%s576_s23 + $0x60] sm:$0xff]  ;;  %v214_v48 = vld [vmem:[%s576_s23 + $0x68] sm:$0xff]  ;;  %v215_v61 = vld [vmem:[%s576_s23 + $0x70] sm:$0xff] }
  0x15   : > { %vm311_vm0 = vcmp.ge.f32.partialorder %v279_v17, 0.0  ;;  %v350_v25 = vmul.f32 %v595_v11, %v279_v17  ;;  %vm312_vm1 = vcmp.ge.f32.partialorder %v280_v18, 0.0  ;;  %v351_v26 = vmul.f32 %v595_v11, %v280_v18  ;;  %v216_v62 = vld [vmem:[%s576_s23 + $0x78] sm:$0xff]  ;;  %v217_v7 = vld [vmem:[%s576_s23 + $0x80] sm:$0xff]  ;;  %v218_v8 = vld [vmem:[%s576_s23 + $0x88] sm:$0xff] }
  0x16   : > { %vm313_vm2 = vcmp.ge.f32.partialorder %v281_v19, 0.0  ;;  %v352_v27 = vmul.f32 %v595_v11, %v281_v19  ;;  %vm314_vm3 = vcmp.ge.f32.partialorder %v282_v21, 0.0  ;;  %v353_v28 = vmul.f32 %v595_v11, %v282_v21  ;;  %v219_v14 = vld [vmem:[%s576_s23 + $0x90] sm:$0xff]  ;;  %v220_v15 = vld [vmem:[%s576_s23 + $0x98] sm:$0xff] }
  0x17   : > { %v382_v30 = vsel %vm311_vm0, %v279_v17, %v350_v25  ;;  %v383_v31 = vsel %vm312_vm1, %v280_v18, %v351_v26  ;;  %vm315_vm4 = vcmp.ge.f32.partialorder %v283_v22, 0.0  ;;  %v354_v32 = vmul.f32 %v595_v11, %v283_v22  ;;  %v221_v26 = vld [vmem:[%s576_s23 + $0xa0] sm:$0xff] }
  0x18   : > { %414 = vst [vmem:[%s613_s30] sm:$0xff] %v382_v30  ;;  %415 = vst [vmem:[%s613_s30 + $0x8] sm:$0xff] %v383_v31  ;;  %v384_v36 = vsel %vm313_vm2, %v281_v19, %v352_v27  ;;  %v385_v37 = vsel %vm314_vm3, %v282_v21, %v353_v28  ;;  %vm316_vm5 = vcmp.ge.f32.partialorder %v284_v23, 0.0  ;;  %v355_v38 = vmul.f32 %v595_v11, %v284_v23  ;;  %v222_v27 = vld [vmem:[%s576_s23 + $0xa8] sm:$0xff] }
  0x19   : > { %416 = vst [vmem:[%s613_s30 + $0x10] sm:$0xff] %v384_v36  ;;  %417 = vst [vmem:[%s613_s30 + $0x18] sm:$0xff] %v385_v37  ;;  %v386_v39 = vsel %vm315_vm4, %v283_v22, %v354_v32  ;;  %v285_v40 = vadd.f32 %v581_v1, %v246_v20  ;;  %v286_v41 = vadd.f32 %v581_v1, %v247_v24 }
  0x1a   : > { %v248_v42 = vmul.f32 %v571_v0, %v209_v29  ;;  %418 = vst [vmem:[%s613_s30 + $0x20] sm:$0xff] %v386_v39  ;;  %v387_v43 = vsel %vm316_vm5, %v284_v23, %v355_v38  ;;  %v249_v44 = vmul.f32 %v571_v0, %v210_v33  ;;  %v250_v45 = vmul.f32 %v571_v0, %v211_v34 }
  0x1b   : > { %v251_v46 = vmul.f32 %v571_v0, %v212_v35  ;;  %419 = vst [vmem:[%s613_s30 + $0x28] sm:$0xff] %v387_v43  ;;  %vm317_vm6 = vcmp.ge.f32.partialorder %v285_v40, 0.0  ;;  %v356_v49 = vmul.f32 %v595_v11, %v285_v40  ;;  %vm318_vm7 = vcmp.ge.f32.partialorder %v286_v41, 0.0 }
  0x1c   : > { %v357_v50 = vmul.f32 %v595_v11, %v286_v41  ;;  %v287_v51 = vadd.f32 %v581_v1, %v248_v42  ;;  %v288_v52 = vadd.f32 %v581_v1, %v249_v44  ;;  %v289_v53 = vadd.f32 %v581_v1, %v250_v45 }
  0x1d   : > { %v290_v54 = vadd.f32 %v581_v1, %v251_v46  ;;  %v388_v55 = vsel %vm317_vm6, %v285_v40, %v356_v49  ;;  %v252_v57 = vmul.f32 %v571_v0, %v213_v47  ;;  %v253_v58 = vmul.f32 %v571_v0, %v214_v48  ;;  %v223_v40 = vld [vmem:[%s576_s23 + $0xb0] sm:$0xff]  ;;  %v225_v48 = vld [vmem:[%s576_s23 + $0xc0] sm:$0xff]  ;;  %v226_v49 = vld [vmem:[%s576_s23 + $0xc8] sm:$0xff] }
  0x1e   : > { %v389_v56 = vsel %vm318_vm7, %v286_v41, %v357_v50  ;;  %420 = vst [vmem:[%s613_s30 + $0x30] sm:$0xff] %v388_v55  ;;  %vm319_vm8 = vcmp.ge.f32.partialorder %v287_v51, 0.0  ;;  %v358_v59 = vmul.f32 %v595_v11, %v287_v51  ;;  %vm320_vm9 = vcmp.ge.f32.partialorder %v288_v52, 0.0  ;;  %v224_v41 = vld [vmem:[%s576_s23 + $0xb8] sm:$0xff] }
  0x1f   : > { %421 = vst [vmem:[%s613_s30 + $0x38] sm:$0xff] %v389_v56  ;;  %v359_v60 = vmul.f32 %v595_v11, %v288_v52  ;;  %vm321_vm10 = vcmp.ge.f32.partialorder %v289_v53, 0.0  ;;  %v360_v63 = vmul.f32 %v595_v11, %v289_v53  ;;  %vm322_vm11 = vcmp.ge.f32.partialorder %v290_v54, 0.0  ;;  %v228_v55 = vld [vmem:[%s576_s23 + $0xd8] sm:$0xff] }
  0x20   : > { %v361_v2 = vmul.f32 %v595_v11, %v290_v54  ;;  %v390_v3 = vsel %vm319_vm8, %v287_v51, %v358_v59  ;;  %v291_v5 = vadd.f32 %v581_v1, %v252_v57  ;;  %v292_v6 = vadd.f32 %v581_v1, %v253_v58 }
  0x21   : > { %v391_v4 = vsel %vm320_vm9, %v288_v52, %v359_v60  ;;  %422 = vst [vmem:[%s613_s30 + $0x40] sm:$0xff] %v390_v3  ;;  %v392_v9 = vsel %vm321_vm10, %v289_v53, %v360_v63  ;;  %v254_v12 = vmul.f32 %v571_v0, %v215_v61  ;;  %v255_v13 = vmul.f32 %v571_v0, %v216_v62 }
  0x22   : > { %423 = vst [vmem:[%s613_s30 + $0x48] sm:$0xff] %v391_v4  ;;  %v393_v10 = vsel %vm322_vm11, %v290_v54, %v361_v2  ;;  %424 = vst [vmem:[%s613_s30 + $0x50] sm:$0xff] %v392_v9  ;;  %vm323_vm12 = vcmp.ge.f32.partialorder %v291_v5, 0.0  ;;  %v362_v16 = vmul.f32 %v595_v11, %v291_v5  ;;  %vm324_vm13 = vcmp.ge.f32.partialorder %v292_v6, 0.0  ;;  %v227_v54 = vld [vmem:[%s576_s23 + $0xd0] sm:$0xff]  ;;  %v229_v4 = vld [vmem:[%s576_s23 + $0xe0] sm:$0xff] }
  0x23   : > { %425 = vst [vmem:[%s613_s30 + $0x58] sm:$0xff] %v393_v10  ;;  %v363_v17 = vmul.f32 %v595_v11, %v292_v6  ;;  %v293_v18 = vadd.f32 %v581_v1, %v254_v12  ;;  %v294_v19 = vadd.f32 %v581_v1, %v255_v13  ;;  %v256_v20 = vmul.f32 %v571_v0, %v217_v7 }
  0x24   : > { %v257_v21 = vmul.f32 %v571_v0, %v218_v8  ;;  %v394_v22 = vsel %vm323_vm12, %v291_v5, %v362_v16  ;;  %v258_v24 = vmul.f32 %v571_v0, %v219_v14  ;;  %v259_v25 = vmul.f32 %v571_v0, %v220_v15  ;;  %v230_v5 = vld [vmem:[%s576_s23 + $0xe8] sm:$0xff] }
  0x25   : > { %v395_v23 = vsel %vm324_vm13, %v292_v6, %v363_v17  ;;  %426 = vst [vmem:[%s613_s30 + $0x60] sm:$0xff] %v394_v22  ;;  %vm325_vm14 = vcmp.ge.f32.partialorder %v293_v18, 0.0  ;;  %v364_v28 = vmul.f32 %v595_v11, %v293_v18  ;;  %vm326_vm15 = vcmp.ge.f32.partialorder %v294_v19, 0.0 }
  0x26   : > { %427 = vst [vmem:[%s613_s30 + $0x68] sm:$0xff] %v395_v23  ;;  %v365_v29 = vmul.f32 %v595_v11, %v294_v19  ;;  %v295_v30 = vadd.f32 %v581_v1, %v256_v20  ;;  %v296_v31 = vadd.f32 %v581_v1, %v257_v21  ;;  %v297_v32 = vadd.f32 %v581_v1, %v258_v24  ;;  %v232_v20 = vld [vmem:[%s576_s23 + $0xf8] sm:$0xff] }
  0x27   : > { %v298_v33 = vadd.f32 %v581_v1, %v259_v25  ;;  %v396_v34 = vsel %vm325_vm14, %v293_v18, %v364_v28  ;;  %v260_v36 = vmul.f32 %v571_v0, %v221_v26  ;;  %v261_v37 = vmul.f32 %v571_v0, %v222_v27 }
  0x28   : > { %v397_v35 = vsel %vm326_vm15, %v294_v19, %v365_v29  ;;  %428 = vst [vmem:[%s613_s30 + $0x70] sm:$0xff] %v396_v34  ;;  %vm327_vm0 = vcmp.ge.f32.partialorder %v295_v30, 0.0  ;;  %v366_v38 = vmul.f32 %v595_v11, %v295_v30  ;;  %vm328_vm1 = vcmp.ge.f32.partialorder %v296_v31, 0.0  ;;  %v231_v19 = vld [vmem:[%s576_s23 + $0xf0] sm:$0xff] }
  0x29   : > { %429 = vst [vmem:[%s613_s30 + $0x78] sm:$0xff] %v397_v35  ;;  %v367_v39 = vmul.f32 %v595_v11, %v296_v31  ;;  %vm329_vm2 = vcmp.ge.f32.partialorder %v297_v32, 0.0  ;;  %v368_v42 = vmul.f32 %v595_v11, %v297_v32  ;;  %vm330_vm3 = vcmp.ge.f32.partialorder %v298_v33, 0.0 }
  0x2a   : > { %v369_v43 = vmul.f32 %v595_v11, %v298_v33  ;;  %v398_v44 = vsel %vm327_vm0, %v295_v30, %v366_v38  ;;  %v299_v46 = vadd.f32 %v581_v1, %v260_v36  ;;  %v300_v47 = vadd.f32 %v581_v1, %v261_v37 }
  0x2b   : > { %v399_v45 = vsel %vm328_vm1, %v296_v31, %v367_v39  ;;  %430 = vst [vmem:[%s613_s30 + $0x80] sm:$0xff] %v398_v44  ;;  %v400_v50 = vsel %vm329_vm2, %v297_v32, %v368_v42  ;;  %v262_v52 = vmul.f32 %v571_v0, %v223_v40  ;;  %v263_v53 = vmul.f32 %v571_v0, %v224_v41 }
  0x2c   : > { %431 = vst [vmem:[%s613_s30 + $0x88] sm:$0xff] %v399_v45  ;;  %v401_v51 = vsel %vm330_vm3, %v298_v33, %v369_v43  ;;  %432 = vst [vmem:[%s613_s30 + $0x90] sm:$0xff] %v400_v50  ;;  %vm331_vm4 = vcmp.ge.f32.partialorder %v299_v46, 0.0  ;;  %v370_v56 = vmul.f32 %v595_v11, %v299_v46  ;;  %vm332_vm5 = vcmp.ge.f32.partialorder %v300_v47, 0.0 }
  0x2d   : > { %433 = vst [vmem:[%s613_s30 + $0x98] sm:$0xff] %v401_v51  ;;  %v371_v57 = vmul.f32 %v595_v11, %v300_v47  ;;  %v301_v58 = vadd.f32 %v581_v1, %v262_v52  ;;  %v302_v59 = vadd.f32 %v581_v1, %v263_v53  ;;  %v264_v60 = vmul.f32 %v571_v0, %v225_v48 }
  0x2e   : > { %v265_v61 = vmul.f32 %v571_v0, %v226_v49  ;;  %v402_v62 = vsel %vm331_vm4, %v299_v46, %v370_v56  ;;  %v266_v2 = vmul.f32 %v571_v0, %v227_v54  ;;  %v267_v3 = vmul.f32 %v571_v0, %v228_v55 }
  0x2f   : > { %v403_v63 = vsel %vm332_vm5, %v300_v47, %v371_v57  ;;  %434 = vst [vmem:[%s613_s30 + $0xa0] sm:$0xff] %v402_v62  ;;  %vm333_vm6 = vcmp.ge.f32.partialorder %v301_v58, 0.0  ;;  %v372_v6 = vmul.f32 %v595_v11, %v301_v58  ;;  %vm334_vm7 = vcmp.ge.f32.partialorder %v302_v59, 0.0 }
  0x30   : > { %435 = vst [vmem:[%s613_s30 + $0xa8] sm:$0xff] %v403_v63  ;;  %v373_v7 = vmul.f32 %v595_v11, %v302_v59  ;;  %v303_v8 = vadd.f32 %v581_v1, %v264_v60  ;;  %v304_v9 = vadd.f32 %v581_v1, %v265_v61  ;;  %v305_v10 = vadd.f32 %v581_v1, %v266_v2 }
  0x31   : > { %v306_v12 = vadd.f32 %v581_v1, %v267_v3  ;;  %v404_v13 = vsel %vm333_vm6, %v301_v58, %v372_v6  ;;  %v268_v15 = vmul.f32 %v571_v0, %v229_v4  ;;  %v269_v16 = vmul.f32 %v571_v0, %v230_v5 }
  0x32   : > { %v405_v14 = vsel %vm334_vm7, %v302_v59, %v373_v7  ;;  %436 = vst [vmem:[%s613_s30 + $0xb0] sm:$0xff] %v404_v13  ;;  %vm335_vm8 = vcmp.ge.f32.partialorder %v303_v8, 0.0  ;;  %v374_v17 = vmul.f32 %v595_v11, %v303_v8  ;;  %vm336_vm9 = vcmp.ge.f32.partialorder %v304_v9, 0.0 }
  0x33   : > { %437 = vst [vmem:[%s613_s30 + $0xb8] sm:$0xff] %v405_v14  ;;  %v375_v18 = vmul.f32 %v595_v11, %v304_v9  ;;  %vm337_vm10 = vcmp.ge.f32.partialorder %v305_v10, 0.0  ;;  %v376_v21 = vmul.f32 %v595_v11, %v305_v10  ;;  %vm338_vm11 = vcmp.ge.f32.partialorder %v306_v12, 0.0 }
  0x34   : > { %v377_v22 = vmul.f32 %v595_v11, %v306_v12  ;;  %v406_v23 = vsel %vm335_vm8, %v303_v8, %v374_v17  ;;  %v307_v25 = vadd.f32 %v581_v1, %v268_v15  ;;  %v308_v26 = vadd.f32 %v581_v1, %v269_v16 }
  0x35   : > { %v407_v24 = vsel %vm336_vm9, %v304_v9, %v375_v18  ;;  %438 = vst [vmem:[%s613_s30 + $0xc0] sm:$0xff] %v406_v23  ;;  %v408_v27 = vsel %vm337_vm10, %v305_v10, %v376_v21  ;;  %v270_v29 = vmul.f32 %v571_v0, %v231_v19  ;;  %v271_v30 = vmul.f32 %v571_v0, %v232_v20 }
  0x36   : > { %439 = vst [vmem:[%s613_s30 + $0xc8] sm:$0xff] %v407_v24  ;;  %v409_v28 = vsel %vm338_vm11, %v306_v12, %v377_v22  ;;  %440 = vst [vmem:[%s613_s30 + $0xd0] sm:$0xff] %v408_v27  ;;  %vm339_vm12 = vcmp.ge.f32.partialorder %v307_v25, 0.0  ;;  %v378_v31 = vmul.f32 %v595_v11, %v307_v25  ;;  %vm340_vm13 = vcmp.ge.f32.partialorder %v308_v26, 0.0 }
  0x37   : > { %441 = vst [vmem:[%s613_s30 + $0xd8] sm:$0xff] %v409_v28  ;;  %v379_v32 = vmul.f32 %v595_v11, %v308_v26  ;;  %v309_v33 = vadd.f32 %v581_v1, %v270_v29  ;;  %v310_v34 = vadd.f32 %v581_v1, %v271_v30 }
  0x38   : > { %v410_v35 = vsel %vm339_vm12, %v307_v25, %v378_v31 }
  0x39   : > { %v411_v36 = vsel %vm340_vm13, %v308_v26, %v379_v32  ;;  %442 = vst [vmem:[%s613_s30 + $0xe0] sm:$0xff] %v410_v35  ;;  %vm341_vm14 = vcmp.ge.f32.partialorder %v309_v33, 0.0  ;;  %v380_v0 = vmul.f32 %v595_v11, %v309_v33  ;;  %vm342_vm15 = vcmp.ge.f32.partialorder %v310_v34, 0.0 }
  0x3a   : > { %443 = vst [vmem:[%s613_s30 + $0xe8] sm:$0xff] %v411_v36  ;;  %v381_v37 = vmul.f32 %v595_v11, %v310_v34 }
  0x3b   : > { %v412_v38 = vsel %vm341_vm14, %v309_v33, %v380_v0 }
  0x3c   : > { %v413_v39 = vsel %vm342_vm15, %v310_v34, %v381_v37  ;;  %444 = vst [vmem:[%s613_s30 + $0xf0] sm:$0xff] %v412_v38 }
  0x3d   : > { %445 = vst [vmem:[%s613_s30 + $0xf8] sm:$0xff] %v413_v39 }
  0x3e PF: > { %s14_s15 = sadd.s32 1, %s530_s15  }
  0x3f   : > { %p11_p4 = scmp.ge.s32.totalorder %s14_s15, 4  }
  0x41   :  { %13 = sbr.rel (!%p11_p4) target bundleno = 1 (0x1), region = 66 }

// kernel: conv_block_forward.2
= control target key start
LH: loop header
LB: loop body
LE: loop exit
PB: predicated region body
PF: predicated region fallthrough
CT: control target
= control target key end

     0   :  { %s1241_s15 = smov 0   ;;  %s1243_s16 = smov 0   ;;  %s1432_s0 = inlined_call_operand.vmem [shape: bf16[512,36], index: 0, kind: input, shape index: {}]   ;;  %s1433_s1 = inlined_call_operand.vmem [shape: bf16[36,128], index: 1, kind: input, shape index: {}]   ;;  %s1434_s2 = inlined_call_operand.vmem [shape: f32[512,128], index: 2, kind: output, shape index: {0}]   ;;  %s1435_s3 = inlined_call_operand.vmem [shape: f32[2,8,128], index: 3, kind: output, shape index: {1}]   ;;  %s1436_s4 = inlined_call_operand.vmem [shape: f32[2,8,128], index: 4, kind: output, shape index: {2}]  }
   0x1   :  { %s1245_s17 = smov 0  }
   0x2 LB: > { %s27_s18 = sadd.s32 1, %s1210_s16  ;;  %p1039_p0 = scmp.ge.s32.totalorder %s1214_s17, 1  ;;  %s1214_s17 = sphi %s1245_s17, %s15_s17   ;;  %s1210_s16 = sphi %s1243_s16, %s1438_s16   ;;  %s1206_s15 = sphi %s1241_s15, %s1437_s15  }
   0x3   : > { %p29_p1 = scmp.ge.s32.totalorder %s27_s18, 2  ;;  %p196_p2 = scmp.lt.s32.totalorder %s1214_s17, 3 }
   0x5   : > { %s1440_s18 = smov (%p29_p1, %s27_s18), 0  ;;  %p197_p3 = pnand %p1039_p0, %p196_p2 }
   0x6   : > { %v1173_v0 = vld [vmem:[%s1433_s1] sm:$0xff] (!%p197_p3)   ;;  %v1174_v1 = vld [vmem:[%s1433_s1 + $0x8] sm:$0xff] (!%p197_p3)   ;;  %s1040_s23 = sshll.u32 (!%p197_p3), %s1206_s15, 5  ;;  %v1175_v2 = vld [vmem:[%s1433_s1 + $0x10] ss:$0 sps:$4 sm:$0x33] (!%p197_p3)  }
   0x7   : > { %200 = sbr.rel (%p197_p3) target bundleno = 311 (0x137), region = 28  ;;  %1102 = vmatprep.subr.bf16.mxu0 (!%p197_p3), %v1173_v0  ;;  %p239_p4 = scmp.lt.s32.totalorder (!%p197_p3), %s1040_s23, 63  ;;  %1140 = vmatprep.subr.bf16.mxu1 (!%p197_p3), %v1173_v0  ;;  %vm517_vm0 = vcmask (!%p197_p3), 1041408   ;;  %vm468_vm1 = vcmask (!%p197_p3), 293888  }
   0x8   : > { %1103 = vmatpush3.bf16.msra.mxu0 (!%p197_p3), %v1173_v0  ;;  %1143 = vmatpush3.bf16.msra.mxu1 (!%p197_p3), %v1173_v0  ;;  %v519_v3 = vsel (!%p197_p3), %vm517_vm0, %v1175_v2, 0  ;;  %p259_p5 = scmp.lt.s32.totalorder (!%p197_p3), %s1206_s15, 1 }
   0x9   : > { %1104 = vmatprep.subr.bf16.mxu0 (!%p197_p3), %v1174_v1  ;;  %1141 = vmatprep.subr.bf16.mxu1 (!%p197_p3), %v1174_v1 }
   0xc   : > { %1105 = vmatpush3.bf16.msra.mxu0 (!%p197_p3), %v1174_v1  ;;  %1144 = vmatpush3.bf16.msra.mxu1 (!%p197_p3), %v1174_v1 }
   0xd   : > { %1146 = vmatprep.subr.msk.bf16.mxu0 (!%p197_p3), %vm517_vm0, %v1175_v2  ;;  %1147 = vmatprep.subr.msk.bf16.mxu1 (!%p197_p3), %vm517_vm0, %v1175_v2 }
   0xe   : > { %s1442_s23 = smov (!%p239_p4, %s1040_s23), 63  ;;  %s1444_s15 = smov (!%p259_p5, %s1206_s15), 1 }
   0xf   : > { %s1041_s26 = sshll.u32 %s1442_s23, 2  ;;  %s1043_s30 = sshll.u32 %s1442_s23, 3 }
  0x10   : > { %s1277_s29 = scalar_lea.vmem %s1432_s0, %s1041_s26  ;;  %1107 = vmatpush3.bf16.msra.mxu0 %v519_v3  ;;  %1145 = vmatpush3.bf16.msra.mxu1 %v519_v3  ;;  %s1315_s7 = scalar_lea.vmem %s1434_s2, %s1043_s30 }
  0x11   : > { %v1176_v4 = vld [vmem:[%s1277_s29] sm:$0xff]   ;;  %v1177_v5 = vld [vmem:[%s1277_s29 + $0x8] sm:$0xff]   ;;  %v1178_v6 = vld [vmem:[%s1277_s29 + $0x10] sm:$0xff]   ;;  %s1044_s8 = sshll.u32 %s1444_s15, 3 }
  0x12   : > { %1108 = vmatprep.mubr.msk.bf16.mxu0 %vm468_vm1, %v1176_v4  ;;  %v1179_v7 = vld [vmem:[%s1277_s29 + $0x18] sm:$0xff]   ;;  %v1184_v8 = vld [vmem:[%s1277_s29 + $0x40] sm:$0xff]   ;;  %v1185_v9 = vld [vmem:[%s1277_s29 + $0x48] sm:$0xff]   ;;  %s262_s11 = scalar_lea.vmem %s1435_s3, %s1044_s8  ;;  %s266_s14 = scalar_lea.vmem %s1436_s4, %s1044_s8 }
  0x13   : > { %1109 = vmatmul.mubr.msk.bf16.vlgmr.msra.gmra.mrb[0].mxu0 %vm468_vm1, %v1177_v5  ;;  %1124 = vmatprep.mubr.msk.bf16.mxu1 %vm468_vm1, %v1184_v8  ;;  %v1186_v10 = vld [vmem:[%s1277_s29 + $0x50] sm:$0xff]   ;;  %v1180_v11 = vld [vmem:[%s1277_s29 + $0x20] sm:$0xff]   ;;  %v1187_v12 = vld [vmem:[%s1277_s29 + $0x58] sm:$0xff]  }
  0x14   : > { %1112 = vmatprep.mubr.msk.bf16.mxu0 %vm468_vm1, %v1178_v6  ;;  %1125 = vmatmul.mubr.msk.bf16.vlgmr.msra.gmra.mrb[0].mxu1 %vm468_vm1, %v1185_v9  ;;  %v1188_v13 = vld [vmem:[%s1277_s29 + $0x60] sm:$0xff]   ;;  %v1181_v14 = vld [vmem:[%s1277_s29 + $0x28] sm:$0xff]   ;;  %v1182_v15 = vld [vmem:[%s1277_s29 + $0x30] sm:$0xff]  }
  0x15   : > { %1128 = vmatprep.mubr.msk.bf16.mxu1 %vm468_vm1, %v1186_v10  ;;  %v1189_v16 = vld [vmem:[%s1277_s29 + $0x68] sm:$0xff]   ;;  %v1190_v17 = vld [vmem:[%s1277_s29 + $0x70] sm:$0xff]   ;;  %v1183_v18 = vld [vmem:[%s1277_s29 + $0x38] sm:$0xff]  }
  0x16   : > { %v1191_v19 = vld [vmem:[%s1277_s29 + $0x78] sm:$0xff]  }
  0x1b   : > { %1113 = vmatmul.mubr.msk.bf16.gmra.mrb[4].mxu0 %vm468_vm1, %v1179_v7 }
  0x1c   : > { %1116 = vmatprep.mubr.msk.bf16.mxu0 %vm468_vm1, %v1180_v11  ;;  %1129 = vmatmul.mubr.msk.bf16.gmra.mrb[4].mxu1 %vm468_vm1, %v1187_v12 }
  0x1d   : > { %1132 = vmatprep.mubr.msk.bf16.mxu1 %vm468_vm1, %v1188_v13 }
  0x23   : > { %1117 = vmatmul.mubr.msk.bf16.gmra.mrb[8].mxu0 %vm468_vm1, %v1181_v14 }
  0x24   : > { %1120 = vmatprep.mubr.msk.bf16.mxu0 %vm468_vm1, %v1182_v15  ;;  %1133 = vmatmul.mubr.msk.bf16.gmra.mrb[8].mxu1 %vm468_vm1, %v1189_v16 }
  0x25   : > { %1136 = vmatprep.mubr.msk.bf16.mxu1 %vm468_vm1, %v1190_v17 }
  0x2b   : > { %1121 = vmatmul.mubr.msk.bf16.gmra.mrb[12].mxu0 %vm468_vm1, %v1183_v18 }
  0x2c   : > { %1137 = vmatmul.mubr.msk.bf16.gmra.mrb[12].mxu1 %vm468_vm1, %v1191_v19 }
  0xe6   : > { %v1110_v20 = vpop.f32.mrb[0].mxu0 }
  0xe7   : > { %v555_v21 = vpop.f32.mrb[1].mxu0  ;;  %716 = vst [vmem:[%s1315_s7 + $0x10] sm:$0xff] %v1110_v20  ;;  %v1320_v24 = vpop.f32.mrb[0].mxu1  ;;  %v820_v30 = vmul.f32 %v1110_v20, %v1110_v20 }
  0xe8   : > { %v1111_v22 = vpop.f32.mrb[2].mxu0  ;;  %714 = vst [vmem:[%s1315_s7] sm:$0xff] %v555_v21  ;;  %v818_v25 = vmul.f32 %v555_v21, %v555_v21  ;;  %v1323_v28 = vpop.f32.mrb[1].mxu1  ;;  %732 = vst [vmem:[%s1315_s7 + $0x90] sm:$0xff] %v1320_v24 }
  0xe9   : > { %v558_v23 = vpop.f32.mrb[3].mxu0  ;;  %717 = vst [vmem:[%s1315_s7 + $0x18] sm:$0xff] %v1111_v22  ;;  %v1325_v29 = vpop.f32.mrb[2].mxu1  ;;  %730 = vst [vmem:[%s1315_s7 + $0x80] sm:$0xff] %v1323_v28  ;;  %v821_v36 = vmul.f32 %v1111_v22, %v1111_v22 }
  0xea   : > { %715 = vst [vmem:[%s1315_s7 + $0x8] sm:$0xff] %v558_v23  ;;  %v781_v26 = vadd.f32 %v558_v23, %v555_v21  ;;  %v819_v27 = vmul.f32 %v558_v23, %v558_v23  ;;  %v1329_v34 = vpop.f32.mrb[3].mxu1  ;;  %733 = vst [vmem:[%s1315_s7 + $0x98] sm:$0xff] %v1325_v29 }
  0xeb   : > { %731 = vst [vmem:[%s1315_s7 + $0x88] sm:$0xff] %v1329_v34 }
  0xec   : > { %v782_v31 = vadd.f32 %v1110_v20, %v781_v26  ;;  %v850_v32 = vadd.f32 %v819_v27, %v818_v25 }
  0xee   : > { %v1114_v33 = vpop.f32.mrb[4].mxu0  ;;  %v851_v37 = vadd.f32 %v850_v32, %v820_v30  ;;  %v783_v38 = vadd.f32 %v1111_v22, %v782_v31 }
  0xef   : > { %v571_v35 = vpop.f32.mrb[5].mxu0  ;;  %720 = vst [vmem:[%s1315_s7 + $0x30] sm:$0xff] %v1114_v33  ;;  %v1340_v44 = vpop.f32.mrb[4].mxu1  ;;  %v824_v50 = vmul.f32 %v1114_v33, %v1114_v33 }
  0xf0   : > { %v1115_v39 = vpop.f32.mrb[6].mxu0  ;;  %718 = vst [vmem:[%s1315_s7 + $0x20] sm:$0xff] %v571_v35  ;;  %v784_v41 = vadd.f32 %v783_v38, %v571_v35  ;;  %v822_v42 = vmul.f32 %v571_v35, %v571_v35  ;;  %v852_v43 = vadd.f32 %v851_v37, %v821_v36  ;;  %v1343_v48 = vpop.f32.mrb[5].mxu1  ;;  %736 = vst [vmem:[%s1315_s7 + $0xb0] sm:$0xff] %v1340_v44 }
  0xf1   : > { %v574_v40 = vpop.f32.mrb[7].mxu0  ;;  %721 = vst [vmem:[%s1315_s7 + $0x38] sm:$0xff] %v1115_v39  ;;  %v1345_v49 = vpop.f32.mrb[6].mxu1  ;;  %734 = vst [vmem:[%s1315_s7 + $0xa0] sm:$0xff] %v1343_v48  ;;  %v825_v56 = vmul.f32 %v1115_v39, %v1115_v39  ;;  %v834_v37 = vmul.f32 %v1323_v28, %v1323_v28 }
  0xf2   : > { %v853_v45 = vadd.f32 %v852_v43, %v822_v42  ;;  %719 = vst [vmem:[%s1315_s7 + $0x28] sm:$0xff] %v574_v40  ;;  %v785_v46 = vadd.f32 %v784_v41, %v574_v40  ;;  %v823_v47 = vmul.f32 %v574_v40, %v574_v40  ;;  %v1349_v54 = vpop.f32.mrb[7].mxu1  ;;  %737 = vst [vmem:[%s1315_s7 + $0xb8] sm:$0xff] %v1345_v49 }
  0xf3   : > { %735 = vst [vmem:[%s1315_s7 + $0xa8] sm:$0xff] %v1349_v54  ;;  %v835_v42 = vmul.f32 %v1329_v34, %v1329_v34  ;;  %v836_v43 = vmul.f32 %v1320_v24, %v1320_v24 }
  0xf4   : > { %v786_v51 = vadd.f32 %v1114_v33, %v785_v46  ;;  %v854_v52 = vadd.f32 %v853_v45, %v823_v47  ;;  %v837_v47 = vmul.f32 %v1325_v29, %v1325_v29 }
  0xf6   : > { %v1118_v53 = vpop.f32.mrb[8].mxu0  ;;  %v855_v57 = vadd.f32 %v854_v52, %v824_v50  ;;  %v787_v58 = vadd.f32 %v1115_v39, %v786_v51 }
  0xf7   : > { %v587_v55 = vpop.f32.mrb[9].mxu0  ;;  %724 = vst [vmem:[%s1315_s7 + $0x50] sm:$0xff] %v1118_v53  ;;  %v1360_v0 = vpop.f32.mrb[8].mxu1  ;;  %v828_v6 = vmul.f32 %v1118_v53, %v1118_v53 }
  0xf8   : > { %v1119_v59 = vpop.f32.mrb[10].mxu0  ;;  %722 = vst [vmem:[%s1315_s7 + $0x40] sm:$0xff] %v587_v55  ;;  %v788_v61 = vadd.f32 %v787_v58, %v587_v55  ;;  %v826_v62 = vmul.f32 %v587_v55, %v587_v55  ;;  %v856_v63 = vadd.f32 %v855_v57, %v825_v56  ;;  %v1363_v4 = vpop.f32.mrb[9].mxu1  ;;  %740 = vst [vmem:[%s1315_s7 + $0xd0] sm:$0xff] %v1360_v0 }
  0xf9   : > { %v590_v60 = vpop.f32.mrb[11].mxu0  ;;  %725 = vst [vmem:[%s1315_s7 + $0x58] sm:$0xff] %v1119_v59  ;;  %v1365_v5 = vpop.f32.mrb[10].mxu1  ;;  %738 = vst [vmem:[%s1315_s7 + $0xc0] sm:$0xff] %v1363_v4  ;;  %v829_v12 = vmul.f32 %v1119_v59, %v1119_v59  ;;  %v839_v56 = vmul.f32 %v1349_v54, %v1349_v54 }
  0xfa   : > { %v857_v1 = vadd.f32 %v856_v63, %v826_v62  ;;  %723 = vst [vmem:[%s1315_s7 + $0x48] sm:$0xff] %v590_v60  ;;  %v789_v2 = vadd.f32 %v788_v61, %v590_v60  ;;  %v827_v3 = vmul.f32 %v590_v60, %v590_v60  ;;  %v654_v10 = vpop.f32.mrb[11].mxu1  ;;  %741 = vst [vmem:[%s1315_s7 + $0xd8] sm:$0xff] %v1365_v5 }
  0xfb   : > { %739 = vst [vmem:[%s1315_s7 + $0xc8] sm:$0xff] %v654_v10 }
  0xfc   : > { %v790_v7 = vadd.f32 %v1118_v53, %v789_v2  ;;  %v858_v8 = vadd.f32 %v857_v1, %v827_v3  ;;  %v843_v1 = vmul.f32 %v654_v10, %v654_v10  ;;  %v844_v2 = vmul.f32 %v1360_v0, %v1360_v0 }
  0xfe   : > { %v1122_v9 = vpop.f32.mrb[12].mxu0  ;;  %v859_v13 = vadd.f32 %v858_v8, %v828_v6  ;;  %v791_v14 = vadd.f32 %v1119_v59, %v790_v7  ;;  %v845_v6 = vmul.f32 %v1365_v5, %v1365_v5 }
  0xff   : > { %v603_v11 = vpop.f32.mrb[13].mxu0  ;;  %728 = vst [vmem:[%s1315_s7 + $0x70] sm:$0xff] %v1122_v9  ;;  %v1138_v20 = vpop.f32.mrb[12].mxu1  ;;  %v832_v27 = vmul.f32 %v1122_v9, %v1122_v9 }
 0x100   : > { %v1123_v15 = vpop.f32.mrb[14].mxu0  ;;  %726 = vst [vmem:[%s1315_s7 + $0x60] sm:$0xff] %v603_v11  ;;  %v792_v17 = vadd.f32 %v791_v14, %v603_v11  ;;  %v830_v18 = vmul.f32 %v603_v11, %v603_v11  ;;  %v860_v19 = vadd.f32 %v859_v13, %v829_v12  ;;  %v667_v25 = vpop.f32.mrb[13].mxu1  ;;  %744 = vst [vmem:[%s1315_s7 + $0xf0] sm:$0xff] %v1138_v20 }
 0x101   : > { %v606_v16 = vpop.f32.mrb[15].mxu0  ;;  %729 = vst [vmem:[%s1315_s7 + $0x78] sm:$0xff] %v1123_v15  ;;  %v1139_v26 = vpop.f32.mrb[14].mxu1  ;;  %742 = vst [vmem:[%s1315_s7 + $0xe0] sm:$0xff] %v667_v25  ;;  %v833_v33 = vmul.f32 %v1123_v15, %v1123_v15  ;;  %v846_v8 = vmul.f32 %v667_v25, %v667_v25  ;;  %v848_v13 = vmul.f32 %v1138_v20, %v1138_v20 }
 0x102   : > { %v861_v21 = vadd.f32 %v860_v19, %v830_v18  ;;  %727 = vst [vmem:[%s1315_s7 + $0x68] sm:$0xff] %v606_v16  ;;  %v793_v22 = vadd.f32 %v792_v17, %v606_v16  ;;  %v831_v23 = vmul.f32 %v606_v16, %v606_v16  ;;  %v670_v32 = vpop.f32.mrb[15].mxu1  ;;  %745 = vst [vmem:[%s1315_s7 + $0xf8] sm:$0xff] %v1139_v26 }
 0x103   : > { %743 = vst [vmem:[%s1315_s7 + $0xe8] sm:$0xff] %v670_v32  ;;  %v849_v16 = vmul.f32 %v1139_v26, %v1139_v26 }
 0x104   : > { %v794_v30 = vadd.f32 %v1122_v9, %v793_v22  ;;  %v862_v31 = vadd.f32 %v861_v21, %v831_v23 }
 0x106   : > { %v863_v35 = vadd.f32 %v862_v31, %v832_v27  ;;  %v795_v36 = vadd.f32 %v1123_v15, %v794_v30 }
 0x108   : > { %v796_v38 = vadd.f32 %v795_v36, %v1323_v28  ;;  %v864_v39 = vadd.f32 %v863_v35, %v833_v33  ;;  %v838_v28 = vmul.f32 %v1343_v48, %v1343_v48 }
 0x10a   : > { %v865_v40 = vadd.f32 %v864_v39, %v834_v37  ;;  %v797_v41 = vadd.f32 %v796_v38, %v1329_v34 }
 0x10c   : > { %v798_v45 = vadd.f32 %v1320_v24, %v797_v41  ;;  %v866_v46 = vadd.f32 %v865_v40, %v835_v42  ;;  %v840_v24 = vmul.f32 %v1340_v44, %v1340_v44 }
 0x10e   : > { %v867_v50 = vadd.f32 %v866_v46, %v836_v43  ;;  %v799_v51 = vadd.f32 %v1325_v29, %v798_v45  ;;  %v841_v29 = vmul.f32 %v1345_v49, %v1345_v49 }
 0x110   : > { %v800_v52 = vadd.f32 %v799_v51, %v1343_v48  ;;  %v868_v53 = vadd.f32 %v867_v50, %v837_v47  ;;  %v842_v48 = vmul.f32 %v1363_v4, %v1363_v4 }
 0x112   : > { %v869_v55 = vadd.f32 %v868_v53, %v838_v28  ;;  %v801_v34 = vadd.f32 %v800_v52, %v1349_v54 }
 0x114   : > { %v802_v57 = vadd.f32 %v1340_v44, %v801_v34  ;;  %v870_v58 = vadd.f32 %v869_v55, %v839_v56 }
 0x116   : > { %v871_v59 = vadd.f32 %v870_v58, %v840_v24  ;;  %v803_v60 = vadd.f32 %v1345_v49, %v802_v57 }
 0x118   : > { %v804_v61 = vadd.f32 %v803_v60, %v1363_v4  ;;  %v872_v62 = vadd.f32 %v871_v59, %v841_v29 }
 0x11a   : > { %v873_v63 = vadd.f32 %v872_v62, %v842_v48  ;;  %v805_v54 = vadd.f32 %v804_v61, %v654_v10  ;;  %v847_v10 = vmul.f32 %v670_v32, %v670_v32 }
 0x11c   : > { %v806_v44 = vadd.f32 %v1360_v0, %v805_v54  ;;  %v874_v3 = vadd.f32 %v873_v63, %v843_v1 }
 0x11e   : > { %v875_v49 = vadd.f32 %v874_v3, %v844_v2  ;;  %v807_v7 = vadd.f32 %v1365_v5, %v806_v44 }
 0x120   : > { %v808_v4 = vadd.f32 %v807_v7, %v667_v25  ;;  %v876_v9 = vadd.f32 %v875_v49, %v845_v6 }
 0x122   : > { %v877_v11 = vadd.f32 %v876_v9, %v846_v8  ;;  %v809_v12 = vadd.f32 %v808_v4, %v670_v32 }
 0x124   : > { %v810_v14 = vadd.f32 %v1138_v20, %v809_v12  ;;  %v878_v15 = vadd.f32 %v877_v11, %v847_v10 }
 0x126   : > { %v811_v0 = vadd.f32 %v1139_v26, %v810_v14  ;;  %v879_v17 = vadd.f32 %v878_v15, %v848_v13 }
 0x128   : > { %v812_v18 = vrot.slane %v811_v0, 4  ;;  %v880_v19 = vadd.f32 %v879_v17, %v849_v16 }
 0x12a   : > { %v813_v21 = vadd.f32 %v812_v18, %v811_v0  ;;  %v881_v22 = vrot.slane %v880_v19, 4 }
 0x12c   : > { %v814_v5 = vrot.slane %v813_v21, 2  ;;  %v882_v23 = vadd.f32 %v881_v22, %v880_v19 }
 0x12e   : > { %v815_v25 = vadd.f32 %v814_v5, %v813_v21  ;;  %v883_v27 = vrot.slane %v882_v23, 2 }
 0x130   : > { %v816_v30 = vrot.slane %v815_v25, 1  ;;  %v884_v31 = vadd.f32 %v883_v27, %v882_v23 }
 0x132   : > { %v817_v20 = vadd.f32 %v816_v30, %v815_v25  ;;  %v885_v32 = vrot.slane %v884_v31, 1 }
 0x134   : > { %v886_v26 = vadd.f32 %v885_v32, %v884_v31  ;;  %887 = vst [vmem:[%s262_s11] sm:$0xff] %v817_v20 }
 0x136   : > { %888 = vst [vmem:[%s266_s14] sm:$0xff] %v886_v26 }
 0x137 PF: > { %s15_s17 = sadd.s32 1, %s1214_s17   ;;  %s1437_s15 = smov %s1210_s16 }
 0x138   : > { %p12_p6 = scmp.ge.s32.totalorder %s15_s17, 4   ;;  %s1438_s16 = smov %s1440_s18 }
 0x13a   :  { %14 = sbr.rel (!%p12_p6) target bundleno = 2 (0x2), region = 93 }

</bundles_post_ra>
